<compile_context>
chip_gen: v7x
topology: tpu7x:2x2x1
jax: 0.10.0
libtpu: 0.0.40
codegen_flags: <defaults>
</compile_context>

<pallas_src>
import jax
import jax.numpy as jnp
from jax.experimental import pallas as pl
from jax.experimental.pallas import tpu as pltpu

# ---- problem sizes (small, consistent with the module) ----
B       = 2    # batch
NB      = 4    # n_band
E       = 8    # n_electrode
T       = 61   # time_points  (T + 3 must be divisible by STRIDE)
M       = 4    # m (filters per band)
STRIDE  = 4    # temporal_stride
K       = 3    # n_classes
C       = NB * M          # channels after SCB = m * n_band       (16)
TP      = T + 3           # padded time length                     (64)
SEG     = TP // STRIDE    # samples per temporal segment           (16)
NE      = NB * E          # stacked electrode rows                 (32)
LANES   = B * TP          # batch folded into lanes                (128)
NSEG    = STRIDE * B      # selector columns, segment-major j=s*B+b (8)
EPS_BN  = 1e-5


def fbcnet_kernel(x_ref, wbd_ref, shift_ref, sel_ref, wcls_ref, bcls_ref, out_ref):
    # x_ref:     (NE, LANES)    input: (band,electrode) rows x batch-major time lanes (zero-padded)
    # wbd_ref:   (C, NE)        block-diagonal grouped conv weight, BN scale folded in
    # shift_ref: (C, 1)         folded conv-bias + BN shift
    # sel_ref:   (LANES, NSEG)  0/1 segment selector (zero at pad / cross-batch lanes)
    # wcls_ref:  (STRIDE, K, C) classifier weight, one (K, C) slab per temporal segment
    # bcls_ref:  (K, 1)         classifier bias
    # out_ref:   (K, B)         logits (transposed; wrapper returns .T)

    # --- SCB: block-diagonal spatial conv + folded BN + Swish (one MXU op, full-lane vregs) ---
    y = jnp.dot(wbd_ref[...], x_ref[...], preferred_element_type=jnp.float32)   # (C, LANES)
    y = y + shift_ref[...]
    y = y * jax.nn.sigmoid(y)                                                    # Swish

    # --- LogVar over temporal segments via selector matmuls (no XLU lane reductions) ---
    sel = sel_ref[...]
    s1 = jnp.dot(y, sel, preferred_element_type=jnp.float32)         # (C, NSEG) segment sums
    s2 = jnp.dot(y * y, sel, preferred_element_type=jnp.float32)     # (C, NSEG) segment sums of squares
    var = (s2 - s1 * s1 * (1.0 / SEG)) * (1.0 / (SEG - 1))           # unbiased; pad samples count as 0
    lv = jnp.log(jnp.clip(var, 1e-6, 1e6))                           # (C, NSEG)

    # --- classifier: per-segment (K,C)@(C,B) matmuls accumulated in (K, B) ---
    acc = jnp.zeros((K, B), jnp.float32)
    for s in range(STRIDE):
        acc = acc + jnp.dot(wcls_ref[s], lv[:, s * B:(s + 1) * B],
                            preferred_element_type=jnp.float32)
    out_ref[...] = (acc + bcls_ref[...]).astype(out_ref.dtype)


def fbcnet_forward(x, w_conv, b_conv, bn_scale, bn_shift, w_fc, b_fc):
    # ---- parameter folding & layout plumbing (tiny arrays, pure XLA glue) ----
    # 1. fold conv bias + BatchNorm (eval) into conv weight / per-channel shift
    w_scaled = w_conv * bn_scale.reshape(NB, M, 1)                     # (NB, M, E)
    shift = (b_conv * bn_scale + bn_shift).reshape(C, 1)               # (C, 1)

    # 2. block-diagonal weight so the grouped conv is one matmul
    eye_nb = jnp.eye(NB, dtype=x.dtype)
    wbd = jnp.einsum('nme,np->nmpe', w_scaled, eye_nb).reshape(C, NE)  # (C, NE)

    # 3. input layout: (B, NB, E, T) -> (NE, B*TP), batch in lanes, time zero-padded T->TP
    x2 = x.reshape(B, NE, T)
    x2 = jnp.pad(x2, ((0, 0), (0, 0), (0, TP - T)))
    x2 = jnp.transpose(x2, (1, 0, 2)).reshape(NE, LANES)               # (NE, 128)

    # 4. segment selector (implements F.pad(...,(0,3)) + per-segment sums), segment-major cols
    lane = jnp.arange(LANES)
    b_id = lane // TP
    t_id = lane % TP
    s_id = t_id // SEG
    col = s_id * B + b_id
    valid = (t_id < T).astype(jnp.float32)
    sel = jax.nn.one_hot(col, NSEG, dtype=jnp.float32) * valid[:, None]   # (LANES, NSEG)

    # 5. classifier weight regrouped per temporal segment: wcls[s, k, c] = w_fc[k, c*STRIDE+s]
    wcls = jnp.transpose(w_fc.reshape(K, C, STRIDE), (2, 0, 1))        # (STRIDE, K, C)
    bcls = b_fc.reshape(K, 1)

    out_t = pl.pallas_call(
        fbcnet_kernel,
        out_shape=jax.ShapeDtypeStruct((K, B), jnp.float32),
        grid_spec=pltpu.PrefetchScalarGridSpec(
            num_scalar_prefetch=0,
            grid=(1,),
            in_specs=[
                pl.BlockSpec((NE, LANES), lambda i: (0, 0)),
                pl.BlockSpec((C, NE), lambda i: (0, 0)),
                pl.BlockSpec((C, 1), lambda i: (0, 0)),
                pl.BlockSpec((LANES, NSEG), lambda i: (0, 0)),
                pl.BlockSpec((STRIDE, K, C), lambda i: (0, 0, 0)),
                pl.BlockSpec((K, 1), lambda i: (0, 0)),
            ],
            out_specs=pl.BlockSpec((K, B), lambda i: (0, 0)),
        ),
        compiler_params=pltpu.CompilerParams(
            dimension_semantics=("arbitrary",)),
    )(x2, wbd, shift, sel, wcls, bcls)

    # (K, B) -> (B, K): wrapper-side layout plumbing on a (3, 2) array.
    return out_t.T


def fbcnet_ref(x, w_conv, b_conv, bn_scale, bn_shift, w_fc, b_fc):
    """Pure-JAX reference mirroring the PyTorch forward semantics."""
    Bn = x.shape[0]
    y = jnp.einsum('bnet,nme->bnmt', x, w_conv).reshape(Bn, C, T)
    y = y + b_conv[None, :, None]
    y = y * bn_scale[None, :, None] + bn_shift[None, :, None]
    y = y * jax.nn.sigmoid(y)
    y = jnp.pad(y, ((0, 0), (0, 0), (0, 3)))
    y = y.reshape(Bn, C, STRIDE, SEG)
    mean = jnp.mean(y, axis=-1, keepdims=True)
    var = jnp.sum((y - mean) ** 2, axis=-1) / (SEG - 1)
    lv = jnp.log(jnp.clip(var, 1e-6, 1e6))            # (B, C, STRIDE)
    f = lv.reshape(Bn, C * STRIDE)
    return f @ w_fc.T + b_fc[None, :]


if __name__ == "__main__":
    key = jax.random.PRNGKey(0)
    ks = jax.random.split(key, 7)

    # input (batch, n_band, n_electrode, time_points)
    x = jax.random.normal(ks[0], (B, NB, E, T), jnp.float32)

    # Conv2dWithConstraint weights: (n_band, m, E), max_norm = 2 per output channel
    w_conv = 0.3 * jax.random.normal(ks[1], (NB, M, E), jnp.float32)
    nrm = jnp.linalg.norm(w_conv, axis=-1, keepdims=True)
    w_conv = w_conv * jnp.where(nrm > 2.0, 2.0 / nrm, 1.0)
    b_conv = 0.1 * jax.random.normal(ks[2], (C,), jnp.float32)

    # BatchNorm2d(C), eval mode with default running stats, deterministic affine
    gamma = 1.0 + 0.1 * jax.random.normal(ks[3], (C,), jnp.float32)
    beta = 0.1 * jax.random.normal(ks[4], (C,), jnp.float32)
    run_mean = jnp.zeros((C,), jnp.float32)
    run_var = jnp.ones((C,), jnp.float32)
    bn_scale = gamma / jnp.sqrt(run_var + EPS_BN)
    bn_shift = beta - run_mean * bn_scale

    # LinearWithConstraint: (n_classes, n_band*m*temporal_stride), max_norm = 0.5 per row
    w_fc = 0.1 * jax.random.normal(ks[5], (K, C * STRIDE), jnp.float32)
    nfc = jnp.linalg.norm(w_fc, axis=-1, keepdims=True)
    w_fc = w_fc * jnp.where(nfc > 0.5, 0.5 / nfc, 1.0)
    b_fc = 0.01 * jax.random.normal(ks[6], (K,), jnp.float32)

    out = fbcnet_forward(x, w_conv, b_conv, bn_scale, bn_shift, w_fc, b_fc)
    out = jax.block_until_ready(out)

    ref = fbcnet_ref(x, w_conv, b_conv, bn_scale, bn_shift, w_fc, b_fc)
    assert out.shape == (B, K), out.shape
    assert jnp.allclose(out, ref, rtol=1e-3, atol=1e-3), (out, ref)

    print("KERNEL_OK")
</pallas_src>

<mosaic_0001>
module attributes {stable_mosaic.version = 11 : i64} {
  func.func @fbcnet_kernel(%arg0: i32, %arg1: memref<32x128xf32, #tpu.memory_space<vmem>>, %arg2: memref<16x32xf32, #tpu.memory_space<vmem>>, %arg3: memref<16x1xf32, #tpu.memory_space<vmem>>, %arg4: memref<128x8xf32, #tpu.memory_space<vmem>>, %arg5: memref<4x3x16xf32, #tpu.memory_space<vmem>>, %arg6: memref<3x1xf32, #tpu.memory_space<vmem>>, %arg7: memref<3x2xf32, #tpu.memory_space<vmem>>) attributes {dimension_semantics = [#tpu.dimension_semantics<arbitrary>], iteration_bounds = array<i64: 1>, scalar_prefetch = 0 : i64, scratch_operands = 0 : i64, tpu.core_type = #tpu.core_type<tc>, window_params = [{pipeline_mode = #tpu.pipeline_mode<synchronous>, transform_indices = @transform_0, window_bounds = array<i64: 32, 128>}, {pipeline_mode = #tpu.pipeline_mode<synchronous>, transform_indices = @transform_1, window_bounds = array<i64: 16, 32>}, {pipeline_mode = #tpu.pipeline_mode<synchronous>, transform_indices = @transform_2, window_bounds = array<i64: 16, 1>}, {pipeline_mode = #tpu.pipeline_mode<synchronous>, transform_indices = @transform_3, window_bounds = array<i64: 128, 8>}, {pipeline_mode = #tpu.pipeline_mode<synchronous>, transform_indices = @transform_4, window_bounds = array<i64: 4, 3, 16>}, {pipeline_mode = #tpu.pipeline_mode<synchronous>, transform_indices = @transform_5, window_bounds = array<i64: 3, 1>}, {pipeline_mode = #tpu.pipeline_mode<synchronous>, transform_indices = @transform_6, window_bounds = array<i64: 3, 2>}]} {
    %c0 = arith.constant 0 : index
    %c0_0 = arith.constant 0 : index
    %0 = vector.load %arg2[%c0, %c0_0] : memref<16x32xf32, #tpu.memory_space<vmem>>, vector<16x32xf32>
    %c0_1 = arith.constant 0 : index
    %c0_2 = arith.constant 0 : index
    %1 = vector.load %arg1[%c0_1, %c0_2] : memref<32x128xf32, #tpu.memory_space<vmem>>, vector<32x128xf32>
    %cst = arith.constant dense<0.000000e+00> : vector<16x128xf32>
    %2 = tpu.matmul %0, %1, %cst {dimension_numbers = #tpu.dot_dimension_numbers<[1], [0], [0], [1], [0, 0, 1, 1], [], []>} : vector<16x32xf32>, vector<32x128xf32>, vector<16x128xf32> -> vector<16x128xf32>
    %c0_3 = arith.constant 0 : index
    %c0_4 = arith.constant 0 : index
    %3 = vector.load %arg3[%c0_3, %c0_4] : memref<16x1xf32, #tpu.memory_space<vmem>>, vector<16x1xf32>
    %4 = vector.broadcast %3 : vector<16x1xf32> to vector<16x128xf32>
    %5 = arith.addf %2, %4 : vector<16x128xf32>
    %6 = arith.negf %5 : vector<16x128xf32>
    %7 = math.exp %6 : vector<16x128xf32>
    %cst_5 = arith.constant 1.000000e+00 : f32
    %8 = vector.broadcast %cst_5 : f32 to vector<16x128xf32>
    %9 = arith.addf %8, %7 : vector<16x128xf32>
    %10 = arith.divf %8, %9 : vector<16x128xf32>
    %11 = arith.mulf %5, %10 : vector<16x128xf32>
    %c0_6 = arith.constant 0 : index
    %c0_7 = arith.constant 0 : index
    %12 = vector.load %arg4[%c0_6, %c0_7] : memref<128x8xf32, #tpu.memory_space<vmem>>, vector<128x8xf32>
    %cst_8 = arith.constant dense<0.000000e+00> : vector<16x8xf32>
    %13 = tpu.matmul %11, %12, %cst_8 {dimension_numbers = #tpu.dot_dimension_numbers<[1], [0], [0], [1], [0, 0, 1, 1], [], []>} : vector<16x128xf32>, vector<128x8xf32>, vector<16x8xf32> -> vector<16x8xf32>
    %14 = arith.mulf %11, %11 : vector<16x128xf32>
    %cst_9 = arith.constant dense<0.000000e+00> : vector<16x8xf32>
    %15 = tpu.matmul %14, %12, %cst_9 {dimension_numbers = #tpu.dot_dimension_numbers<[1], [0], [0], [1], [0, 0, 1, 1], [], []>} : vector<16x128xf32>, vector<128x8xf32>, vector<16x8xf32> -> vector<16x8xf32>
    %16 = arith.mulf %13, %13 : vector<16x8xf32>
    %cst_10 = arith.constant 6.250000e-02 : f32
    %17 = vector.broadcast %cst_10 : f32 to vector<16x8xf32>
    %18 = arith.mulf %16, %17 : vector<16x8xf32>
    %19 = arith.subf %15, %18 : vector<16x8xf32>
    %cst_11 = arith.constant 0.0666666701 : f32
    %20 = vector.broadcast %cst_11 : f32 to vector<16x8xf32>
    %21 = arith.mulf %19, %20 : vector<16x8xf32>
    %cst_12 = arith.constant 9.99999997E-7 : f32
    %cst_13 = arith.constant 1.000000e+06 : f32
    %22 = vector.broadcast %cst_12 : f32 to vector<16x8xf32>
    %23 = arith.maximumf %22, %21 : vector<16x8xf32>
    %24 = vector.broadcast %cst_13 : f32 to vector<16x8xf32>
    %25 = arith.minimumf %24, %23 : vector<16x8xf32>
    %26 = math.log %25 : vector<16x8xf32>
    %cst_14 = arith.constant 0.000000e+00 : f32
    %27 = vector.broadcast %cst_14 : f32 to vector<3x2xf32>
    %c0_15 = arith.constant 0 : index
    %c0_16 = arith.constant 0 : index
    %c0_17 = arith.constant 0 : index
    %28 = vector.load %arg5[%c0_15, %c0_16, %c0_17] : memref<4x3x16xf32, #tpu.memory_space<vmem>>, vector<1x3x16xf32>
    %29 = vector.shape_cast %28 : vector<1x3x16xf32> to vector<3x16xf32>
    %30 = vector.extract_strided_slice %26 {offsets = [0, 0], sizes = [16, 2], strides = [1, 1]} : vector<16x8xf32> to vector<16x2xf32>
    %cst_18 = arith.constant dense<0.000000e+00> : vector<3x2xf32>
    %31 = tpu.matmul %29, %30, %cst_18 {dimension_numbers = #tpu.dot_dimension_numbers<[1], [0], [0], [1], [0, 0, 1, 1], [], []>} : vector<3x16xf32>, vector<16x2xf32>, vector<3x2xf32> -> vector<3x2xf32>
    %32 = arith.addf %27, %31 : vector<3x2xf32>
    %c1 = arith.constant 1 : index
    %c0_19 = arith.constant 0 : index
    %c0_20 = arith.constant 0 : index
    %33 = vector.load %arg5[%c1, %c0_19, %c0_20] : memref<4x3x16xf32, #tpu.memory_space<vmem>>, vector<1x3x16xf32>
    %34 = vector.shape_cast %33 : vector<1x3x16xf32> to vector<3x16xf32>
    %35 = vector.extract_strided_slice %26 {offsets = [0, 2], sizes = [16, 2], strides = [1, 1]} : vector<16x8xf32> to vector<16x2xf32>
    %cst_21 = arith.constant dense<0.000000e+00> : vector<3x2xf32>
    %36 = tpu.matmul %34, %35, %cst_21 {dimension_numbers = #tpu.dot_dimension_numbers<[1], [0], [0], [1], [0, 0, 1, 1], [], []>} : vector<3x16xf32>, vector<16x2xf32>, vector<3x2xf32> -> vector<3x2xf32>
    %37 = arith.addf %32, %36 : vector<3x2xf32>
    %c2 = arith.constant 2 : index
    %c0_22 = arith.constant 0 : index
    %c0_23 = arith.constant 0 : index
    %38 = vector.load %arg5[%c2, %c0_22, %c0_23] : memref<4x3x16xf32, #tpu.memory_space<vmem>>, vector<1x3x16xf32>
    %39 = vector.shape_cast %38 : vector<1x3x16xf32> to vector<3x16xf32>
    %40 = vector.extract_strided_slice %26 {offsets = [0, 4], sizes = [16, 2], strides = [1, 1]} : vector<16x8xf32> to vector<16x2xf32>
    %cst_24 = arith.constant dense<0.000000e+00> : vector<3x2xf32>
    %41 = tpu.matmul %39, %40, %cst_24 {dimension_numbers = #tpu.dot_dimension_numbers<[1], [0], [0], [1], [0, 0, 1, 1], [], []>} : vector<3x16xf32>, vector<16x2xf32>, vector<3x2xf32> -> vector<3x2xf32>
    %42 = arith.addf %37, %41 : vector<3x2xf32>
    %c3 = arith.constant 3 : index
    %c0_25 = arith.constant 0 : index
    %c0_26 = arith.constant 0 : index
    %43 = vector.load %arg5[%c3, %c0_25, %c0_26] : memref<4x3x16xf32, #tpu.memory_space<vmem>>, vector<1x3x16xf32>
    %44 = vector.shape_cast %43 : vector<1x3x16xf32> to vector<3x16xf32>
    %45 = vector.extract_strided_slice %26 {offsets = [0, 6], sizes = [16, 2], strides = [1, 1]} : vector<16x8xf32> to vector<16x2xf32>
    %cst_27 = arith.constant dense<0.000000e+00> : vector<3x2xf32>
    %46 = tpu.matmul %44, %45, %cst_27 {dimension_numbers = #tpu.dot_dimension_numbers<[1], [0], [0], [1], [0, 0, 1, 1], [], []>} : vector<3x16xf32>, vector<16x2xf32>, vector<3x2xf32> -> vector<3x2xf32>
    %47 = arith.addf %42, %46 : vector<3x2xf32>
    %c0_28 = arith.constant 0 : index
    %c0_29 = arith.constant 0 : index
    %48 = vector.load %arg6[%c0_28, %c0_29] : memref<3x1xf32, #tpu.memory_space<vmem>>, vector<3x1xf32>
    %49 = vector.broadcast %48 : vector<3x1xf32> to vector<3x2xf32>
    %50 = arith.addf %47, %49 : vector<3x2xf32>
    %c0_30 = arith.constant 0 : index
    %c0_31 = arith.constant 0 : index
    %51 = vector.load %arg7[%c0_30, %c0_31] : memref<3x2xf32, #tpu.memory_space<vmem>>, vector<3x2xf32>
    tpu.vector_store %arg7[%c0_30, %c0_31], %50 {strides = array<i32>} : memref<3x2xf32, #tpu.memory_space<vmem>>, vector<3x2xf32>,
    return
  }
  func.func @transform_0(%arg0: i32) -> (i32, i32) {
    %c0_i32 = arith.constant 0 : i32
    %c0_i32_0 = arith.constant 0 : i32
    %c0_i32_1 = arith.constant 0 : i32
    return %c0_i32, %c0_i32_0 : i32, i32
  }
  func.func @transform_1(%arg0: i32) -> (i32, i32) {
    %c0_i32 = arith.constant 0 : i32
    %c0_i32_0 = arith.constant 0 : i32
    %c0_i32_1 = arith.constant 0 : i32
    return %c0_i32, %c0_i32_0 : i32, i32
  }
  func.func @transform_2(%arg0: i32) -> (i32, i32) {
    %c0_i32 = arith.constant 0 : i32
    %c0_i32_0 = arith.constant 0 : i32
    %c0_i32_1 = arith.constant 0 : i32
    return %c0_i32, %c0_i32_0 : i32, i32
  }
  func.func @transform_3(%arg0: i32) -> (i32, i32) {
    %c0_i32 = arith.constant 0 : i32
    %c0_i32_0 = arith.constant 0 : i32
    %c0_i32_1 = arith.constant 0 : i32
    return %c0_i32, %c0_i32_0 : i32, i32
  }
  func.func @transform_4(%arg0: i32) -> (i32, i32, i32) {
    %c0_i32 = arith.constant 0 : i32
    %c0_i32_0 = arith.constant 0 : i32
    %c0_i32_1 = arith.constant 0 : i32
    %c0_i32_2 = arith.constant 0 : i32
    return %c0_i32, %c0_i32_0, %c0_i32_1 : i32, i32, i32
  }
  func.func @transform_5(%arg0: i32) -> (i32, i32) {
    %c0_i32 = arith.constant 0 : i32
    %c0_i32_0 = arith.constant 0 : i32
    %c0_i32_1 = arith.constant 0 : i32
    return %c0_i32, %c0_i32_0 : i32, i32
  }
  func.func @transform_6(%arg0: i32) -> (i32, i32) {
    %c0_i32 = arith.constant 0 : i32
    %c0_i32_0 = arith.constant 0 : i32
    %c0_i32_1 = arith.constant 0 : i32
    return %c0_i32, %c0_i32_0 : i32, i32
  }
}

</mosaic_0001>

<bundles_post_ra>
// kernel: tpu_custom_call.1
= control target key start
LH: loop header
LB: loop body
LE: loop exit
PB: predicated region body
PF: predicated region fallthrough
CT: control target
= control target key end

     0   :  { %vm41_vm0 = vcmask 261120   ;;  %v950_v3 = vmov 0   ;;  %vm952_vm1 = vmmov 0   ;;  %s955_s16 = smov 126   ;;  %vm332_vm2 = vcmask 130048   ;;  %s1092_s0 = inlined_call_operand.vmem [shape: f32[32,128], index: 0, kind: input, shape index: {}]   ;;  %s1093_s1 = inlined_call_operand.vmem [shape: f32[16,32], index: 1, kind: input, shape index: {}]   ;;  %s1094_s2 = inlined_call_operand.vmem [shape: f32[16,1], index: 2, kind: input, shape index: {}]   ;;  %s1095_s3 = inlined_call_operand.vmem [shape: f32[128,8], index: 3, kind: input, shape index: {}]   ;;  %s1096_s5 = inlined_call_operand.vmem [shape: f32[3,1], index: 5, kind: input, shape index: {}]   ;;  %s1097_s4 = inlined_call_operand.vmem [shape: f32[4,3,16], index: 4, kind: input, shape index: {}]   ;;  %s1098_s6 = inlined_call_operand.vmem [shape: f32[3,2], index: 6, kind: output, shape index: {}]  }
   0x1   :  { %v25_v0 = vld [vmem:[%s1092_s0] sm:$0xff]  ;;  %v26_v1 = vld [vmem:[%s1092_s0 + $0x8] sm:$0xff]  ;;  %v27_v2 = vld [vmem:[%s1092_s0 + $0x10] sm:$0xff]  ;;  %921 = vset.pattern.permute.xlu0 %v950_v3  ;;  %937 = vset.pattern.permute.xlu1 %v950_v3  ;;  %vm650_vm3 = vcmask 10240  }
   0x2   :  { %v830_v4 = vpack.c.bf16 %v26_v1, %v25_v0  ;;  %v28_v5 = vld [vmem:[%s1092_s0 + $0x18] sm:$0xff]  ;;  %v23_v6 = vld [vmem:[%s1093_s1] sm:$0xff]  ;;  %v30_v9 = vld [vmem:[%s1094_s2 + $0x8] sm:$0xff] }
   0x3   :  { %v834_v7 = vpack.c.bf16 %v28_v5, %v27_v2  ;;  %729 = vmatprep.mubr.msk.f32.mxu0 %vm41_vm0, %v23_v6  ;;  %v29_v8 = vld [vmem:[%s1094_s2] sm:$0xff]  ;;  %v24_v10 = vld [vmem:[%s1093_s1 + $0x8] sm:$0xff]  ;;  %v139_v14 = vld [vmem:[%s1095_s3 + $0x10] sm:$0xff]  ;;  %v951_v5 = vmov 0.0|0.0   ;;  %v953_v6 = vmov 0.0   ;;  %s956_s1 = smov 124  }
   0x4   :  { %831 = vmatprep.subr.bf16.mxu0 %v830_v4  ;;  %33 = vperm.xlu0 %921, %v29_v8   ;;  %v137_v11 = vld [vmem:[%s1095_s3] sm:$0xff]  ;;  %v138_v12 = vld [vmem:[%s1095_s3 + $0x8] sm:$0xff]  ;;  %v140_v15 = vld [vmem:[%s1095_s3 + $0x18] sm:$0xff] }
   0x5   :  { %833 = vmatpush3.bf16.msra.mxu0 %v830_v4  ;;  %v838_v13 = vpack.c.bf16 %v138_v12, %v137_v11  ;;  %v842_v16 = vpack.c.bf16 %v140_v15, %v139_v14  ;;  %v141_v17 = vld [vmem:[%s1095_s3 + $0x20] sm:$0xff]  ;;  %v142_v18 = vld [vmem:[%s1095_s3 + $0x28] sm:$0xff]  ;;  %v143_v20 = vld [vmem:[%s1095_s3 + $0x30] sm:$0xff] }
   0x6   :  { %835 = vmatprep.subr.bf16.mxu0 %v834_v7  ;;  %v846_v19 = vpack.c.bf16 %v142_v18, %v141_v17  ;;  %v144_v21 = vld [vmem:[%s1095_s3 + $0x38] sm:$0xff]  ;;  %v145_v23 = vld [vmem:[%s1095_s3 + $0x40] sm:$0xff]  ;;  %v146_v24 = vld [vmem:[%s1095_s3 + $0x48] sm:$0xff] }
   0x7   :  { %839 = vmatprep.subr.bf16.mxu1 %v838_v13  ;;  %v850_v22 = vpack.c.bf16 %v144_v21, %v143_v20  ;;  %v854_v25 = vpack.c.bf16 %v146_v24, %v145_v23  ;;  %v147_v26 = vld [vmem:[%s1095_s3 + $0x50] sm:$0xff]  ;;  %v148_v27 = vld [vmem:[%s1095_s3 + $0x58] sm:$0xff]  ;;  %v149_v29 = vld [vmem:[%s1095_s3 + $0x60] sm:$0xff] }
   0x8   :  { %38 = vperm.xlu0 %921, %v30_v9   ;;  %841 = vmatpush3.bf16.msra.mxu1 %v838_v13  ;;  %v858_v28 = vpack.c.bf16 %v148_v27, %v147_v26  ;;  %v150_v30 = vld [vmem:[%s1095_s3 + $0x68] sm:$0xff]  ;;  %v151_v32 = vld [vmem:[%s1095_s3 + $0x70] sm:$0xff]  ;;  %v152_v33 = vld [vmem:[%s1095_s3 + $0x78] sm:$0xff]  ;;  %s954_s3 = smov 122  }
   0x9   :  { %837 = vmatpush3.bf16.msra.mxu0 %v834_v7  ;;  %843 = vmatprep.subr.bf16.mxu1 %v842_v16  ;;  %v862_v31 = vpack.c.bf16 %v150_v30, %v149_v29  ;;  %v866_v34 = vpack.c.bf16 %v152_v33, %v151_v32  ;;  %v321_v26 = vld [vmem:[%s1097_s4] sm:$0x7]  ;;  %v663_v27 = vld [vmem:[%s1097_s4 + $0x8] sm:$0x7]  ;;  %v665_v29 = vld [vmem:[%s1097_s4 + $0xc] sm:$0x7] }
   0xa   :  { %871 = vmatprep.subr.bf16.mxu0 %v838_v13 }
   0xc   :  { %730 = vmatmul.mubr.msk.f32.vlgmr.msra.gmra.mrb[0].mxu0 %vm41_vm0, %v24_v10  ;;  %845 = vmatpush3.bf16.msra.mxu1 %v842_v16 }
   0xd   :  { %873 = vmatpush3.bf16.msra.mxu0 %v838_v13  ;;  %847 = vmatprep.subr.bf16.mxu1 %v846_v19  ;;  %v643_v13 = vld [vmem:[%s1096_s5] sm:$0x7] }
   0xe   :  { %875 = vmatprep.subr.bf16.mxu0 %v842_v16 }
  0x10   :  { %849 = vmatpush3.bf16.msra.mxu1 %v846_v19 }
  0x11   :  { %877 = vmatpush3.bf16.msra.mxu0 %v842_v16  ;;  %851 = vmatprep.subr.bf16.mxu1 %v850_v22 }
  0x12   :  { %879 = vmatprep.subr.bf16.mxu0 %v846_v19 }
  0x14   :  { %853 = vmatpush3.bf16.msra.mxu1 %v850_v22 }
  0x15   :  { %881 = vmatpush3.bf16.msra.mxu0 %v846_v19  ;;  %855 = vmatprep.subr.bf16.mxu1 %v854_v25 }
  0x16   :  { %883 = vmatprep.subr.bf16.mxu0 %v850_v22 }
  0x18   :  { %857 = vmatpush3.bf16.msra.mxu1 %v854_v25 }
  0x19   :  { %885 = vmatpush3.bf16.msra.mxu0 %v850_v22  ;;  %859 = vmatprep.subr.bf16.mxu1 %v858_v28  ;;  %v660_v22 = vld [vmem:[%s1097_s4 + $0x4] sm:$0x7] }
  0x1a   :  { %887 = vmatprep.subr.bf16.mxu0 %v854_v25 }
  0x1c   :  { %861 = vmatpush3.bf16.msra.mxu1 %v858_v28 }
  0x1d   :  { %889 = vmatpush3.bf16.msra.mxu0 %v854_v25  ;;  %863 = vmatprep.subr.bf16.mxu1 %v862_v31 }
  0x1e   :  { %891 = vmatprep.subr.bf16.mxu0 %v858_v28 }
  0x20   :  { %865 = vmatpush3.bf16.msra.mxu1 %v862_v31 }
  0x21   :  { %893 = vmatpush3.bf16.msra.mxu0 %v858_v28  ;;  %867 = vmatprep.subr.bf16.mxu1 %v866_v34 }
  0x22   :  { %895 = vmatprep.subr.bf16.mxu0 %v862_v31 }
  0x24   :  { %869 = vmatpush3.bf16.msra.mxu1 %v866_v34 }
  0x25   :  { %897 = vmatpush3.bf16.msra.mxu0 %v862_v31  ;;  %902 = vmatprep.subr.bf16.mxu1 %v951_v5 }
  0x26   :  { %899 = vmatprep.subr.bf16.mxu0 %v866_v34 }
  0x29   :  { %901 = vmatpush3.bf16.msra.mxu0 %v866_v34 }
  0x2a   :  { %908 = vmatprep.subr.bf16.mxu0 %v951_v5 }
  0x83   :  { %v34_v35 = vpop.permute.xlu0 %33 }
  0x87   :  { %v39_v36 = vpop.permute.xlu0 %38 }
  0xdf   :  { %v731_v37 = vpop.f32.mrb[0].mxu0 }
  0xe0   :  { %v120_v38 = vadd.f32 %v731_v37, %v39_v36  ;;  %v114_v39 = vpop.f32.mrb[1].mxu0 }
  0xe1   :  { %v115_v40 = vadd.f32 %v114_v39, %v34_v35 }
  0xe2   :  { %v659_v41 = vmul.f32 -1.442695, %v120_v38 }
  0xe3   :  { %v658_v42 = vmul.f32 -1.442695, %v115_v40 }
  0xe4   :  { %938 = vpow2.f32 %v659_v41 }
  0xe5   :  { %940 = vpow2.f32 %v658_v42 }
  0xee   :  { %v939_v43 = vpop.eup %938 }
  0xef   :  { %v941_v44 = vpop.eup %940  ;;  %v130_v45 = vadd.f32 1.0, %v939_v43 }
  0xf0   :  { %v129_v46 = vadd.f32 1.0, %v941_v44 }
  0xf1   :  { %942 = vrcp.f32 %v130_v45 }
  0xf2   :  { %944 = vrcp.f32 %v129_v46 }
  0xfb   :  { %v943_v47 = vpop.eup %942 }
  0xfc   :  { %v945_v48 = vpop.eup %944  ;;  %v136_v49 = vmul.f32 %v943_v47, %v120_v38 }
  0xfd   :  { %v135_v50 = vmul.f32 %v945_v48, %v115_v40 }
  0xfe   :  { %v229_v52 = vmul.f32 %v136_v49, %v136_v49 }
  0xff   :  { %764 = vmatprep.mubr.f32.mxu1 %v135_v50  ;;  %v228_v51 = vmul.f32 %v135_v50, %v135_v50 }
 0x100   :  { %765 = vmatmul.mubr.f32.vlgmr.msra.gmra.mrb[0].mxu1 %v136_v49 }
 0x101   :  { %799 = vmatprep.mubr.f32.mxu0 %v228_v51  ;;  %806 = vmatprep.mubr.msk.f32.mxu1 %vm952_vm1, %v953_v6 }
 0x102   :  { %800 = vmatmul.mubr.f32.vlgmr.msra.gmra.mrb[2].mxu0 %v229_v52 }
 0x103   :  { %820 = vmatprep.mubr.msk.f32.mxu0 %vm952_vm1, %v953_v6 }
 0x1d3   :  { %v766_v53 = vpop.f32.mrb[0].mxu1 }
 0x1d4   :  { %v306_v54 = vmul.f32 %v766_v53, %v766_v53  ;;  %v219_v55 = vpop.f32.mrb[1].mxu1 }
 0x1d5   :  { %v305_v56 = vmul.f32 %v219_v55, %v219_v55  ;;  %v801_v57 = vpop.f32.mrb[2].mxu0 }
 0x1d6   :  { %v308_v58 = vmul.f32 0.0625, %v306_v54  ;;  %v296_v59 = vpop.f32.mrb[3].mxu0 }
 0x1d7   :  { %v307_v60 = vmul.f32 0.0625, %v305_v56 }
 0x1d8   :  { %v310_v61 = vsub.f32 %v801_v57, %v308_v58 }
 0x1d9   :  { %v309_v62 = vsub.f32 %v296_v59, %v307_v60 }
 0x1da   :  { %v312_v63 = vmul.f32 0.06666667, %v310_v61 }
 0x1db   :  { %v311_v0 = vmul.f32 0.06666667, %v309_v62 }
 0x1dc   :  { %v314_v1 = vmax.f32 %v312_v63, 1e-06 }
 0x1dd   :  { %v313_v2 = vmax.f32 %v311_v0, 1e-06 }
 0x1de   :  { %v316_v3 = vmin.f32 %v314_v1, 1000000.0 }
 0x1df   :  { %v315_v4 = vmin.f32 %v313_v2, 1000000.0 }
 0x1e0   :  { %946 = vlog2.f32 %v316_v3 }
 0x1e1   :  { %948 = vlog2.f32 %v315_v4 }
 0x1ea   :  { %v947_v7 = vpop.eup %946 }
 0x1eb   :  { %v949_v8 = vpop.eup %948  ;;  %v320_v9 = vmul.f32 0.6931472, %v947_v7 }
 0x1ec   :  { %v318_v10 = vmul.f32 0.6931472, %v949_v8 }
 0x1ee   :  { %v932_v11 = vpack.i.bf16 %v320_v9, %v318_v10  ;;  %v906_v12 = vpack.c.bf16 %v320_v9, %v318_v10 }
 0x1f0   :  { %933 = vrot.lane.b32.xlu0 %v932_v11, %s954_s3  ;;  %923 = vrot.lane.b32.xlu1 %v932_v11, %s955_s16 }
 0x1f4   :  { %928 = vrot.lane.b32.xlu1 %v932_v11, %s956_s1 }
 0x1f8   :  { %646 = vperm.xlu1 %937, %v643_v13  }
 0x262   :  { %v924_v14 = vpop.permute.xlu1 %923  ;;  %v934_v18 = vpop.permute.xlu0 %933 }
 0x263   :  { %v926_v15 = vunpack.i.h.bf16 %v924_v14  ;;  %v925_v16 = vunpack.i.l.bf16 %v924_v14  ;;  %v936_v23 = vunpack.i.h.bf16 %v934_v18  ;;  %v935_v24 = vunpack.i.l.bf16 %v934_v18 }
 0x265   :  { %v903_v17 = vpack.c.bf16 %v926_v15, %v925_v16  ;;  %v912_v28 = vpack.c.bf16 %v936_v23, %v935_v24 }
 0x266   :  { %v929_v19 = vpop.permute.xlu1 %928 }
 0x267   :  { %v931_v20 = vunpack.i.h.bf16 %v929_v19  ;;  %v930_v21 = vunpack.i.l.bf16 %v929_v19  ;;  %904 = vmatpush3.bf16.msra.mxu1 %v903_v17 }
 0x268   :  { %905 = vmatprep.subr.bf16.mxu1 %v951_v5 }
 0x269   :  { %v909_v25 = vpack.c.bf16 %v931_v20, %v930_v21 }
 0x26a   :  { %807 = vmatmul.mubr.msk.f32.vlgmr.msra.gmra.mrb[2].mxu1 %vm332_vm2, %v660_v22 }
 0x26b   :  { %907 = vmatpush3.bf16.msra.mxu1 %v906_v12  ;;  %910 = vmatpush3.bf16.msra.mxu0 %v909_v25 }
 0x26c   :  { %813 = vmatprep.mubr.msk.f32.mxu1 %vm952_vm1, %v953_v6  ;;  %911 = vmatprep.subr.bf16.mxu1 %v951_v5 }
 0x26e   :  { %814 = vmatmul.mubr.msk.f32.vlgmr.msra.gmra.mrb[4].mxu1 %vm332_vm2, %v321_v26  ;;  %821 = vmatmul.mubr.msk.f32.vlgmr.msra.gmra.mrb[4].mxu0 %vm332_vm2, %v663_v27 }
 0x26f   :  { %913 = vmatpush3.bf16.msra.mxu1 %v912_v28  ;;  %827 = vmatprep.mubr.msk.f32.mxu1 %vm952_vm1, %v953_v6 }
 0x272   :  { %828 = vmatmul.mubr.msk.f32.vlgmr.msra.gmra.mrb[6].mxu1 %vm332_vm2, %v665_v29 }
 0x277   :  { %v647_v39 = vpop.permute.xlu1 %646 }
 0x33d   :  { %v402_v30 = vpop.f32.mrb[2].mxu1 }
 0x33e   :  { %v808_v31 = vpop.f32.mrb[3].mxu1 }
 0x341   :  { %v475_v32 = vpop.f32.mrb[4].mxu1  ;;  %v556_v33 = vpop.f32.mrb[4].mxu0 }
 0x342   :  { %v476_v34 = vadd.f32 %v475_v32, %v402_v30  ;;  %v815_v35 = vpop.f32.mrb[5].mxu1  ;;  %v822_v36 = vpop.f32.mrb[5].mxu0 }
 0x344   :  { %v560_v37 = vadd.f32 %v556_v33, %v476_v34 }
 0x345   :  { %v638_v38 = vpop.f32.mrb[6].mxu1 }
 0x346   :  { %v642_v40 = vadd.f32 %v638_v38, %v560_v37  ;;  %v829_v41 = vpop.f32.mrb[7].mxu1 }
 0x348   :  { %v649_v42 = vadd.f32 %v647_v39, %v642_v40 }
 0x34a   :  { %651 = vst.msk [vmem:[%s1098_s6] sm:$0x7] %vm650_vm3, %v649_v42 }

</bundles_post_ra>
